<compile_context>
chip_gen: v7x
topology: tpu7x:2x2x1
jax: 0.10.0
libtpu: 0.0.40
codegen_flags: <defaults>
</compile_context>

<pallas_src>
import functools

import jax
import jax.numpy as jnp
from jax.experimental import pallas as pl
from jax.experimental.pallas import tpu as pltpu


# ----------------------------------------------------------------------------
# Kernel
# ----------------------------------------------------------------------------
def _dis_kernel(
    x_ref,      # (BB*N, D)   bf16  flattened points for this batch block
    w1_ref,     # (D, H)      bf16
    w23_ref,    # (2, H, H)   bf16  [W2 (encoder), W3 (pool)]
    w4_ref,     # (H, L)      bf16
    b123_ref,   # (3, H)      f32   [b1, b2, b3]
    b4_ref,     # (1, L)      f32
    o_ref,      # (1, BB, L)  f32
    *,
    n_points: int,
):
    f32 = jnp.float32
    bf16 = jnp.bfloat16
    bb = o_ref.shape[1]                                    # batches in this block

    # ---- encoder: per-point MLP with tanh (bf16 MXU inputs, f32 accumulate) --
    x = x_ref[...]                                         # (BB*N, D) bf16
    h = jnp.dot(x, w1_ref[...], preferred_element_type=f32) + b123_ref[0:1, :]
    h = jnp.tanh(h)                                        # f32 tanh (EUP)
    h = (jnp.dot(h.astype(bf16), w23_ref[0], preferred_element_type=f32)
         + b123_ref[1:2, :])
    h = jnp.tanh(h)                                        # (BB*N, H) f32

    # ---- mean pool over points: sublane/XLU reduction (no block-diag matmul) -
    z = jnp.mean(h.reshape(bb, n_points, h.shape[-1]), axis=1)   # (BB, H) f32

    # ---- pool MLP with ReLU ---------------------------------------------------
    z = (jnp.dot(z.astype(bf16), w23_ref[1], preferred_element_type=f32)
         + b123_ref[2:3, :])
    z = jnp.maximum(z, 0.0)                                # (BB, H)
    z = (jnp.dot(z.astype(bf16), w4_ref[...], preferred_element_type=f32)
         + b4_ref[...])
    z = jnp.maximum(z, 0.0)                                # (BB, L)

    o_ref[0] = z.astype(o_ref.dtype)


# ----------------------------------------------------------------------------
# Wrapper helpers
# ----------------------------------------------------------------------------
def pack_dis_params(params):
    """Pack weights once (outside the per-call path): bf16 weights, f32 biases."""
    bf16 = jnp.bfloat16
    f32 = jnp.float32
    return {
        "w1": params["W1"].astype(bf16),                                   # (D, H)
        "w23": jnp.stack([params["W2"], params["W3"]]).astype(bf16),       # (2, H, H)
        "w4": params["W4"].astype(bf16),                                   # (H, L)
        "b123": jnp.stack([params["b1"], params["b2"], params["b3"]]).astype(f32),
        "b4": params["b4"].reshape(1, -1).astype(f32),                     # (1, L)
    }


def _choose_batch_block(B, N):
    """>=2 grid steps when possible (DMA overlap + both TCs on v7x), blocks
    kept within a conservative VMEM point budget (safe for v7x's 64 MiB)."""
    if B <= 1:
        return B
    # Per-point block-resident cost: bf16 x (double-buffered) + f32 h, both
    # lane-padded to 128 -> ~1 KiB/point.  16K points ~ 16 MiB.
    point_budget = 16384
    bb = max(1, B // 2)
    while bb > 1 and bb * N > point_budget:
        bb //= 2
    while bb > 1 and (B % bb != 0 or (bb * N) % 8 != 0):
        bb -= 1
    if B % bb != 0 or (bb * N) % 8 != 0:
        return B          # collapsed grid: full-dim blocks are always legal
    return bb


def dis_pointcloud_forward(x, packed, *, batch_block=None):
    B, N, D = x.shape
    H = packed["w1"].shape[1]
    L = packed["w4"].shape[1]

    if batch_block is None:
        batch_block = _choose_batch_block(B, N)
    assert B % batch_block == 0
    num_blocks = B // batch_block
    assert (batch_block * N) % 8 == 0 or num_blocks == 1, (
        "batch_block * N must be a multiple of 8 unless the grid is collapsed")

    # Flatten batch*points on the host (fused by XLA) so the encoder runs as two
    # full-width bf16 MXU matmuls inside the kernel.
    x_flat = x.reshape(B * N, D).astype(jnp.bfloat16)

    # Advisory cost estimate so XLA can overlap this (short) kernel.
    flops = 2 * B * N * (D * H + H * H) + 2 * B * (H * H + H * L)
    transcendentals = 2 * B * N * H
    bytes_accessed = int(
        x_flat.size * 2
        + sum(int(v.size) * v.dtype.itemsize for v in packed.values())
        + B * L * 4)
    cost = pl.CostEstimate(flops=flops, transcendentals=transcendentals,
                           bytes_accessed=bytes_accessed)

    grid_spec = pltpu.PrefetchScalarGridSpec(
        num_scalar_prefetch=0,
        grid=(num_blocks,),
        in_specs=[
            pl.BlockSpec((batch_block * N, D), lambda i: (i, 0)),
            pl.BlockSpec(packed["w1"].shape, lambda i: (0, 0)),
            pl.BlockSpec(packed["w23"].shape, lambda i: (0, 0, 0)),
            pl.BlockSpec(packed["w4"].shape, lambda i: (0, 0)),
            pl.BlockSpec(packed["b123"].shape, lambda i: (0, 0)),
            pl.BlockSpec(packed["b4"].shape, lambda i: (0, 0)),
        ],
        # Block equals the full trailing dims -> always-legal, unmasked store.
        out_specs=pl.BlockSpec((1, batch_block, L), lambda i: (i, 0, 0)),
    )

    out = pl.pallas_call(
        functools.partial(_dis_kernel, n_points=N),
        out_shape=jax.ShapeDtypeStruct((num_blocks, batch_block, L), jnp.float32),
        grid_spec=grid_spec,
        compiler_params=pltpu.CompilerParams(
            dimension_semantics=("parallel",)),
        cost_estimate=cost,
    )(x_flat, packed["w1"], packed["w23"], packed["w4"],
      packed["b123"], packed["b4"])

    return out.reshape(B, L)


# ----------------------------------------------------------------------------
# Pure-JAX references (for correctness check)
# ----------------------------------------------------------------------------
def dis_pointcloud_reference(x, params, matmul_dtype=jnp.float32):
    c = lambda a: a.astype(matmul_dtype)
    dot = lambda a, b: jnp.dot(c(a), c(b), preferred_element_type=jnp.float32)
    h = jnp.tanh(dot(x, params["W1"]) + params["b1"])
    h = jnp.tanh(dot(h, params["W2"]) + params["b2"])
    z = jnp.mean(h, axis=1)
    z = jax.nn.relu(dot(z, params["W3"]) + params["b3"])
    z = jax.nn.relu(dot(z, params["W4"]) + params["b4"])
    return z


# ----------------------------------------------------------------------------
# Main
# ----------------------------------------------------------------------------
if __name__ == "__main__":
    # Module defaults: input_dim=6, hidden_dim=64, latent_dim=128.
    B, N, INPUT_DIM = 2, 64, 6
    HIDDEN = 64
    LATENT = 128

    key = jax.random.PRNGKey(0)
    keys = jax.random.split(key, 10)

    def winit(k, shape, scale=0.1):
        return jax.random.normal(k, shape, dtype=jnp.float32) * scale

    params = {
        "W1": winit(keys[0], (INPUT_DIM, HIDDEN)),
        "b1": winit(keys[1], (HIDDEN,)),
        "W2": winit(keys[2], (HIDDEN, HIDDEN)),
        "b2": winit(keys[3], (HIDDEN,)),
        "W3": winit(keys[4], (HIDDEN, HIDDEN)),
        "b3": winit(keys[5], (HIDDEN,)),
        "W4": winit(keys[6], (HIDDEN, LATENT)),
        "b4": winit(keys[7], (LATENT,)),
    }

    x = jax.random.normal(keys[8], (B, N, INPUT_DIM), dtype=jnp.float32)

    # Pack weights once (resident bf16 weight set, ~6 DMA descriptors).
    packed = pack_dis_params(params)

    z = dis_pointcloud_forward(x, packed)
    z = jax.block_until_ready(z)
    assert z.shape == (B, LATENT), z.shape

    # Tight check vs a bf16-matmul-matched reference, loose check vs pure f32.
    z_ref_bf16 = jax.block_until_ready(
        dis_pointcloud_reference(x, params, matmul_dtype=jnp.bfloat16))
    z_ref_f32 = jax.block_until_ready(
        dis_pointcloud_reference(x, params, matmul_dtype=jnp.float32))

    if not jnp.allclose(z, z_ref_bf16, atol=5e-3, rtol=5e-3):
        raise AssertionError("Pallas kernel mismatch vs bf16-matched reference")
    if not jnp.allclose(z, z_ref_f32, atol=3e-2, rtol=3e-2):
        raise AssertionError("Pallas kernel mismatch vs f32 reference")

    print("KERNEL_OK")
</pallas_src>

<mosaic_0001>
module attributes {stable_mosaic.version = 11 : i64} {
  func.func @_dis_kernel(%arg0: i32, %arg1: memref<64x6xbf16, #tpu.memory_space<vmem>>, %arg2: memref<6x64xbf16, #tpu.memory_space<vmem>>, %arg3: memref<2x64x64xbf16, #tpu.memory_space<vmem>>, %arg4: memref<64x128xbf16, #tpu.memory_space<vmem>>, %arg5: memref<3x64xf32, #tpu.memory_space<vmem>>, %arg6: memref<1x128xf32, #tpu.memory_space<vmem>>, %arg7: memref<1x1x128xf32, #tpu.memory_space<vmem>>) attributes {dimension_semantics = [#tpu.dimension_semantics<parallel>], iteration_bounds = array<i64: 2>, scalar_prefetch = 0 : i64, scratch_operands = 0 : i64, tpu.core_type = #tpu.core_type<tc>, window_params = [{transform_indices = @transform_0, window_bounds = array<i64: 64, 6>}, {pipeline_mode = #tpu.pipeline_mode<synchronous>, transform_indices = @transform_1, window_bounds = array<i64: 6, 64>}, {pipeline_mode = #tpu.pipeline_mode<synchronous>, transform_indices = @transform_2, window_bounds = array<i64: 2, 64, 64>}, {pipeline_mode = #tpu.pipeline_mode<synchronous>, transform_indices = @transform_3, window_bounds = array<i64: 64, 128>}, {pipeline_mode = #tpu.pipeline_mode<synchronous>, transform_indices = @transform_4, window_bounds = array<i64: 3, 64>}, {pipeline_mode = #tpu.pipeline_mode<synchronous>, transform_indices = @transform_5, window_bounds = array<i64: 1, 128>}, {transform_indices = @transform_6, window_bounds = array<i64: 1, 1, 128>}]} {
    %c0 = arith.constant 0 : index
    %c0_0 = arith.constant 0 : index
    %0 = vector.load %arg1[%c0, %c0_0] : memref<64x6xbf16, #tpu.memory_space<vmem>>, vector<64x6xbf16>
    %c0_1 = arith.constant 0 : index
    %c0_2 = arith.constant 0 : index
    %1 = vector.load %arg2[%c0_1, %c0_2] : memref<6x64xbf16, #tpu.memory_space<vmem>>, vector<6x64xbf16>
    %cst = arith.constant dense<0.000000e+00> : vector<64x64xf32>
    %2 = tpu.matmul %0, %1, %cst {dimension_numbers = #tpu.dot_dimension_numbers<[1], [0], [0], [1], [0, 0, 1, 1], [], []>} : vector<64x6xbf16>, vector<6x64xbf16>, vector<64x64xf32> -> vector<64x64xf32>
    %c0_3 = arith.constant 0 : index
    %c0_4 = arith.constant 0 : index
    %3 = vector.load %arg5[%c0_3, %c0_4] : memref<3x64xf32, #tpu.memory_space<vmem>>, vector<1x64xf32>
    %4 = vector.broadcast %3 : vector<1x64xf32> to vector<64x64xf32>
    %5 = arith.addf %2, %4 : vector<64x64xf32>
    %6 = math.tanh %5 : vector<64x64xf32>
    %7 = arith.truncf %6 : vector<64x64xf32> to vector<64x64xbf16>
    %c0_5 = arith.constant 0 : index
    %c0_6 = arith.constant 0 : index
    %c0_7 = arith.constant 0 : index
    %8 = vector.load %arg3[%c0_5, %c0_6, %c0_7] : memref<2x64x64xbf16, #tpu.memory_space<vmem>>, vector<1x64x64xbf16>
    %9 = vector.shape_cast %8 : vector<1x64x64xbf16> to vector<64x64xbf16>
    %cst_8 = arith.constant dense<0.000000e+00> : vector<64x64xf32>
    %10 = tpu.matmul %7, %9, %cst_8 {dimension_numbers = #tpu.dot_dimension_numbers<[1], [0], [0], [1], [0, 0, 1, 1], [], []>} : vector<64x64xbf16>, vector<64x64xbf16>, vector<64x64xf32> -> vector<64x64xf32>
    %c1 = arith.constant 1 : index
    %c0_9 = arith.constant 0 : index
    %11 = vector.load %arg5[%c1, %c0_9] : memref<3x64xf32, #tpu.memory_space<vmem>>, vector<1x64xf32>
    %12 = vector.broadcast %11 : vector<1x64xf32> to vector<64x64xf32>
    %13 = arith.addf %10, %12 : vector<64x64xf32>
    %14 = math.tanh %13 : vector<64x64xf32>
    %15 = vector.shape_cast %14 : vector<64x64xf32> to vector<1x64x64xf32>
    %cst_10 = arith.constant dense<0.000000e+00> : vector<1x64xf32>
    %16 = vector.multi_reduction <add>, %15, %cst_10 [1] : vector<1x64x64xf32> to vector<1x64xf32>
    %cst_11 = arith.constant 6.400000e+01 : f32
    %17 = vector.broadcast %cst_11 : f32 to vector<1x64xf32>
    %18 = arith.divf %16, %17 : vector<1x64xf32>
    %19 = arith.truncf %18 : vector<1x64xf32> to vector<1x64xbf16>
    %c1_12 = arith.constant 1 : index
    %c0_13 = arith.constant 0 : index
    %c0_14 = arith.constant 0 : index
    %20 = vector.load %arg3[%c1_12, %c0_13, %c0_14] : memref<2x64x64xbf16, #tpu.memory_space<vmem>>, vector<1x64x64xbf16>
    %21 = vector.shape_cast %20 : vector<1x64x64xbf16> to vector<64x64xbf16>
    %cst_15 = arith.constant dense<0.000000e+00> : vector<1x64xf32>
    %22 = tpu.matmul %19, %21, %cst_15 {dimension_numbers = #tpu.dot_dimension_numbers<[1], [0], [0], [1], [0, 0, 1, 1], [], []>} : vector<1x64xbf16>, vector<64x64xbf16>, vector<1x64xf32> -> vector<1x64xf32>
    %c2 = arith.constant 2 : index
    %c0_16 = arith.constant 0 : index
    %23 = vector.load %arg5[%c2, %c0_16] : memref<3x64xf32, #tpu.memory_space<vmem>>, vector<1x64xf32>
    %24 = arith.addf %22, %23 : vector<1x64xf32>
    %cst_17 = arith.constant 0.000000e+00 : f32
    %25 = vector.broadcast %cst_17 : f32 to vector<1x64xf32>
    %26 = arith.maximumf %24, %25 : vector<1x64xf32>
    %27 = arith.truncf %26 : vector<1x64xf32> to vector<1x64xbf16>
    %c0_18 = arith.constant 0 : index
    %c0_19 = arith.constant 0 : index
    %28 = vector.load %arg4[%c0_18, %c0_19] : memref<64x128xbf16, #tpu.memory_space<vmem>>, vector<64x128xbf16>
    %cst_20 = arith.constant dense<0.000000e+00> : vector<1x128xf32>
    %29 = tpu.matmul %27, %28, %cst_20 {dimension_numbers = #tpu.dot_dimension_numbers<[1], [0], [0], [1], [0, 0, 1, 1], [], []>} : vector<1x64xbf16>, vector<64x128xbf16>, vector<1x128xf32> -> vector<1x128xf32>
    %c0_21 = arith.constant 0 : index
    %c0_22 = arith.constant 0 : index
    %30 = vector.load %arg6[%c0_21, %c0_22] : memref<1x128xf32, #tpu.memory_space<vmem>>, vector<1x128xf32>
    %31 = arith.addf %29, %30 : vector<1x128xf32>
    %cst_23 = arith.constant 0.000000e+00 : f32
    %32 = vector.broadcast %cst_23 : f32 to vector<1x128xf32>
    %33 = arith.maximumf %31, %32 : vector<1x128xf32>
    %c0_24 = arith.constant 0 : index
    %c0_25 = arith.constant 0 : index
    %c0_26 = arith.constant 0 : index
    %34 = vector.load %arg7[%c0_24, %c0_25, %c0_26] : memref<1x1x128xf32, #tpu.memory_space<vmem>>, vector<1x1x128xf32>
    %35 = vector.shape_cast %34 : vector<1x1x128xf32> to vector<1x128xf32>
    %36 = vector.shape_cast %33 : vector<1x128xf32> to vector<1x1x128xf32>
    tpu.vector_store %arg7[%c0_24, %c0_25, %c0_26], %36 {strides = array<i32>} : memref<1x1x128xf32, #tpu.memory_space<vmem>>, vector<1x1x128xf32>,
    return
  }
  func.func @transform_0(%arg0: i32) -> (i32, i32) {
    %c0_i32 = arith.constant 0 : i32
    %c0_i32_0 = arith.constant 0 : i32
    return %arg0, %c0_i32 : i32, i32
  }
  func.func @transform_1(%arg0: i32) -> (i32, i32) {
    %c0_i32 = arith.constant 0 : i32
    %c0_i32_0 = arith.constant 0 : i32
    %c0_i32_1 = arith.constant 0 : i32
    return %c0_i32, %c0_i32_0 : i32, i32
  }
  func.func @transform_2(%arg0: i32) -> (i32, i32, i32) {
    %c0_i32 = arith.constant 0 : i32
    %c0_i32_0 = arith.constant 0 : i32
    %c0_i32_1 = arith.constant 0 : i32
    %c0_i32_2 = arith.constant 0 : i32
    return %c0_i32, %c0_i32_0, %c0_i32_1 : i32, i32, i32
  }
  func.func @transform_3(%arg0: i32) -> (i32, i32) {
    %c0_i32 = arith.constant 0 : i32
    %c0_i32_0 = arith.constant 0 : i32
    %c0_i32_1 = arith.constant 0 : i32
    return %c0_i32, %c0_i32_0 : i32, i32
  }
  func.func @transform_4(%arg0: i32) -> (i32, i32) {
    %c0_i32 = arith.constant 0 : i32
    %c0_i32_0 = arith.constant 0 : i32
    %c0_i32_1 = arith.constant 0 : i32
    return %c0_i32, %c0_i32_0 : i32, i32
  }
  func.func @transform_5(%arg0: i32) -> (i32, i32) {
    %c0_i32 = arith.constant 0 : i32
    %c0_i32_0 = arith.constant 0 : i32
    %c0_i32_1 = arith.constant 0 : i32
    return %c0_i32, %c0_i32_0 : i32, i32
  }
  func.func @transform_6(%arg0: i32) -> (i32, i32, i32) {
    %c0_i32 = arith.constant 0 : i32
    %c0_i32_0 = arith.constant 0 : i32
    %c0_i32_1 = arith.constant 0 : i32
    return %arg0, %c0_i32, %c0_i32_0 : i32, i32, i32
  }
}

</mosaic_0001>

<bundles_post_ra>
// kernel: tpu_custom_call.1
= control target key start
LH: loop header
LB: loop body
LE: loop exit
PB: predicated region body
PF: predicated region fallthrough
CT: control target
= control target key end

     0   :  { %11 = vsyncpa [#allocation3], 0  ;;  %s1326_s0 = inlined_call_operand.vmem [shape: bf16[128,6], index: 0, kind: input, shape index: {}]   ;;  %s1327_s1 = inlined_call_operand.vmem [shape: bf16[6,64], index: 1, kind: input, shape index: {}]   ;;  %s1328_s2 = inlined_call_operand.vmem [shape: bf16[2,64,64], index: 2, kind: input, shape index: {}]   ;;  %s1329_s3 = inlined_call_operand.hbm [shape: bf16[64,128], index: 3, kind: input, shape index: {}]   ;;  %s1330_s4 = inlined_call_operand.vmem [shape: f32[3,64], index: 4, kind: input, shape index: {}]   ;;  %s1331_s5 = inlined_call_operand.vmem [shape: f32[1,128], index: 5, kind: input, shape index: {}]   ;;  %s1332_s6 = inlined_call_operand.hbm [shape: f32[2,1,128], index: 6, kind: output, shape index: {}]  }
   0x1   :  { %12 = vsyncpa [#allocation4], 0 }
   0x2   :  { %14 = vsyncpa [#allocation4 + $0x1], 0  ;;  %s1139_s21 = smov 0   ;;  %s1141_s22 = smov 0  }
   0x3   :  { %s1143_s23 = smov 0   ;;  %s1145_s24 = smov 0  }
   0x4 LB: > { %s1160_s25 = sadd.s32 4294967295, %s1096_s24   ;;  %s779_s26 = sadd.s32 4294967294, %s1096_s24   ;;  %s1096_s24 = sphi %s1145_s24, %s1348_s24   ;;  %s1092_s23 = sphi %s1143_s23, %s1347_s23   ;;  %s1088_s22 = sphi %s1141_s22, %s1346_s22   ;;  %s1084_s21 = sphi %s1139_s21, %s1345_s21  }
   0x5   : > { %s1164_s27 = sadd.s32 1, %s1096_s24   ;;  %s158_s28 = sadd.s32 1, %s1092_s23 }
   0x6   : > { %s155_s29 = ssub.s32 %s1096_s24, %s1164_s27  ;;  %p168_p0 = scmp.ne.s32.totalorder %s1092_s23, %s1088_s22 }
   0x7   : > { %p156_p1 = scmp.eq.s32.totalorder %s155_s29, 0  ;;  %p169_p2 = scmp.eq.s32.totalorder %s1160_s25, 1 }
   0x8   : > { %p174_p3 = scmp.ne.s32.totalorder %s1088_s22, %s1084_s21  ;;  %p175_p4 = scmp.eq.s32.totalorder %s779_s26, 1 }
   0x9   : > { %s1175_s30 = scalar_select %p156_p1, %s1092_s23, %s158_s28  }
   0xa   : > { %p1177_p5 = por %p169_p2, %p168_p0  ;;  %p1181_p6 = por %p175_p4, %p174_p3 }
   0xb   : > { %p780_p7 = scmp.ge.s32.totalorder %s1096_s24, 1  ;;  %p182_p8 = scmp.lt.s32.totalorder %s1096_s24, 3 }
   0xc   : > { %s1336_s7 = scalar_select %p1177_p5, 1, 0 }
   0xd   : > { %s1337_s8 = scalar_select %p1181_p6, 1, 0 }
   0xe   : > { %p1333_p9 = scmp.eq.s32.totalorder %s1160_s25, 0  ;;  %p1188_p10 = pnand %p780_p7, %p182_p8 }
   0xf   : > { %s1098_s10 = smov [#allocation2]   ;;  %s1002_s15 = scalar_lea.hbm %s1329_s3, 512 }
  0x10   : > { %s1338_s9 = scalar_select %p1188_p10, 1, 0 }
  0x11   : > { %s200_s11 = sshll.u32 %s1098_s10, 4  ;;  %p906_p11 = pneg %p1188_p10  ;;  %s201_s11 = int_to_ptr.vmem [resolvable:$true] %s200_s11 }
  0x12   : > { %p1003_p13 = scmp.ne.s32.totalorder %s1329_s3, %s1002_s15  ;;  %p1009_p3 = scmp.lt.u32.totalorder %s1002_s15, %s1329_s3 }
  0x13   : > { %p1196_p12 = pnand %p1333_p9, %p906_p11 }
  0x15   : > { %p1004_p0 = pneg %p1196_p12 }
  0x17   : > { %p1005_p1 = pnand %p1004_p0, %p1003_p13 }
  0x19   : > { %p1006_p2 = pneg %p1005_p1 }
  0x1b   : > { %p1011_p4 = pnand %p1009_p3, %p1006_p2 }
  0x1d   : > { %1014 = shalt.err (!%p1011_p4)
}
  0x1e   : > { %s1015_s20 = scalar_lea.vmem %s201_s11, 512  ;;  %p1023_p9 = scmp.lt.s32.totalorder %s201_s11, %s201_s11 }
  0x1f   : > { %p1016_p7 = scmp.ne.s32.totalorder %s201_s11, %s1015_s20  ;;  %p1024_p6 = scmp.lt.s32.totalorder %s1015_s20, %s1015_s20 }
  0x21   : > { %p1018_p8 = pnand %p1016_p7, %p1004_p0  ;;  %p1025_p5 = por %p1024_p6, %p1023_p9 }
  0x23   : > { %p1019_p11 = pneg %p1018_p8 }
  0x25   : > { %p1026_p10 = pnand %p1025_p5, %p1019_p11 }
  0x27   : > { %1029 = shalt.err (!%p1026_p10)
}
  0x28   : > { %s1099_s26 = smov 64   ;;  %s1100_s28 = smov 4  }
  0x29   : > { %909 = dma.hbm_to_vmem [thread:$0]  (!%p1196_p12), %s1329_s3, 512, %s201_s11, [#allocation3], %s1099_s26, %s1099_s26, %s1100_s28  }
  0x2a   : > { %p1340_p13 = scmp.ne.s32.totalorder %s1338_s9, 0 }
  0x2b   : > { %p1341_p1 = scmp.eq.s32.totalorder (!%p1340_p13), %s1160_s25, 0 }
  0x2c   : > { %231 = sbr.rel (%p1340_p13) target bundleno = 998 (0x3e6), region = 44 }
  0x33   : > { %1075 = dma.done.wait (%p1341_p1), [#allocation3], 512   ;;  %p1342_p0 = pmov %p1341_p1 }
  0x34   : > { %s785_s13 = sshll.u32 %s1160_s25, 3  ;;  %vm314_vm0 = vcmask 1042432   ;;  %vm301_vm1 = vcmask 48128   ;;  %v275_v0 = vld [vmem:[%s1327_s1] sm:$0x7]  ;;  %v959_v7 = vld [vmem:[%s1328_s2 + $0x8] sm:$0xff]  }
  0x35   : > { %1077 = vsyncadd (%p1342_p0), [#allocation3], 4294966784  ;;  %p261_p5 = scmp.lt.s32.totalorder %s785_s13, 15  ;;  %899 = vmatprep.subr.msk.bf16.mxu0 %vm314_vm0, %v275_v0  ;;  %v316_v1 = vsel %vm314_vm0, %v275_v0, 0  ;;  %v958_v6 = vld [vmem:[%s1328_s2] sm:$0xff]   ;;  %v960_v8 = vld [vmem:[%s1328_s2 + $0x10] sm:$0xff]  }
  0x36   : > { %850 = vmatpush3.bf16.msra.mxu0 %v316_v1  ;;  %859 = vmatprep.subr.bf16.mxu1 %v958_v6  ;;  %v961_v9 = vld [vmem:[%s1328_s2 + $0x18] sm:$0xff]   ;;  %v787_v10 = vld [vmem:[%s1330_s4] ss:$0 sm:$0xff]  ;;  %vm432_vm2 = vcmask 523264   ;;  %v1101_v40 = vmov 0.0   ;;  %v963_v41 = vld [vmem:[%s1328_s2 + $0x28] sm:$0xff]  }
  0x37   : > { %s1350_s13 = smov (!%p261_p5, %s785_s13), 15  ;;  %860 = vmatpush3.bf16.msra.mxu1 %v958_v6  ;;  %v962_v39 = vld [vmem:[%s1328_s2 + $0x20] sm:$0xff]   ;;  %875 = vmatprep.subr.bf16.mxu0 %v1101_v40  ;;  %v964_v42 = vld [vmem:[%s1328_s2 + $0x30] sm:$0xff]   ;;  %vm1102_vm3 = vmmov 0   ;;  %v965_v43 = vld [vmem:[%s1328_s2 + $0x38] sm:$0xff]   ;;  %s258_s10 = sand.u32 1, %s1088_s22  }
  0x38   : > { %s786_s14 = sshll.u32 %s1350_s13, 2  ;;  %861 = vmatprep.subr.bf16.mxu1 %v959_v7  ;;  %v966_v44 = vld [vmem:[#allocation2] sm:$0xff]   ;;  %v967_v45 = vld [vmem:[#allocation2 + $0x8] sm:$0xff]   ;;  %v968_v46 = vld [vmem:[#allocation2 + $0x10] sm:$0xff]   ;;  %s823_s12 = sshll.u32 %s1160_s25, 4 }
  0x39   : > { %s264_s16 = scalar_lea.vmem %s1326_s0, %s786_s14  ;;  %v796_v47 = vld [vmem:[%s1330_s4 + $0x1] ss:$0 sm:$0xff]  ;;  %s259_s15 = scalar_lea.vmem [#allocation5], %s258_s10 }
  0x3a   : > { %v954_v2 = vld [vmem:[%s264_s16] sm:$0xff]   ;;  %v955_v3 = vld [vmem:[%s264_s16 + $0x8] sm:$0xff]   ;;  %v956_v4 = vld [vmem:[%s264_s16 + $0x10] sm:$0xff]   ;;  %s1284_s17 = scalar_lea.hbm %s1332_s6, %s823_s12  ;;  %s700_s18 = scalar_lea.sflag [#allocation4], %s258_s10 }
  0x3b   : > { %851 = vmatprep.mubr.msk.bf16.mxu0 %vm301_vm1, %v954_v2  ;;  %v957_v5 = vld [vmem:[%s264_s16 + $0x18] sm:$0xff]   ;;  %862 = vmatpush3.bf16.msra.mxu1 %v959_v7  ;;  %s712_s16 = sshll.u32 %s259_s15, 4  ;;  %p1343_p9 = scmp.ne.s32.totalorder %s1336_s7, 0  ;;  %s1286_s16 = int_to_ptr.vmem [resolvable:$true] %s712_s16 }
  0x3c   : > { %852 = vmatmul.mubr.msk.bf16.vlgmr.msra.gmra.mrb[0].mxu0 %vm301_vm1, %v955_v3  ;;  %863 = vmatprep.subr.bf16.mxu1 %v960_v8  ;;  %s1030_s25 = scalar_lea.vmem %s1286_s16, 16  ;;  %s1103_s19 = smov [#allocation5]  }
  0x3d   : > { %855 = vmatprep.mubr.msk.bf16.mxu0 %vm301_vm1, %v956_v4  ;;  %876 = vmatpush3.bf16.msra.mxu0 %v962_v39  ;;  %p1031_p6 = scmp.ne.s32.totalorder %s1286_s16, %s1030_s25  ;;  %s1034_s20 = sshll.u32 %s1103_s19, 4  ;;  %s1035_s20 = int_to_ptr.vmem [resolvable:$false] %s1034_s20 }
  0x3e   : > { %877 = vmatprep.subr.bf16.mxu0 %v1101_v40  ;;  %s1036_s26 = scalar_lea.vmem %s1035_s20, 32  ;;  %p1037_p2 = scmp.lt.s32.totalorder %s1286_s16, %s1035_s20 }
  0x3f   : > { %864 = vmatpush3.bf16.msra.mxu1 %v960_v8  ;;  %p1032_p10 = pnand %p1031_p6, %p1343_p9  ;;  %p1038_p3 = scmp.lt.s32.totalorder %s1036_s26, %s1030_s25 }
  0x40   : > { %865 = vmatprep.subr.bf16.mxu1 %v961_v9 }
  0x41   : > { %878 = vmatpush3.bf16.msra.mxu0 %v963_v41  ;;  %p1033_p12 = pneg %p1032_p10  ;;  %p1039_p4 = por %p1038_p3, %p1037_p2 }
  0x42   : > { %879 = vmatprep.subr.bf16.mxu0 %v1101_v40 }
  0x43   : > { %866 = vmatpush3.bf16.msra.mxu1 %v961_v9  ;;  %p1040_p7 = pnand %p1039_p4, %p1033_p12 }
  0x44   : > { %856 = vmatmul.mubr.msk.bf16.gmra.mrb[4].mxu0 %vm301_vm1, %v957_v5  ;;  %887 = vmatprep.subr.bf16.mxu1 %v1101_v40 }
  0x45   : > { %883 = vmatprep.mubr.msk.bf16.mxu0 %vm1102_vm3, %v1101_v40  ;;  %880 = vmatpush3.bf16.msra.mxu0 %v964_v42 }
  0x46   : > { %881 = vmatprep.subr.bf16.mxu0 %v1101_v40 }
  0x49   : > { %882 = vmatpush3.bf16.msra.mxu0 %v965_v43 }
 0x10f   : > { %v853_v11 = vpop.f32.mrb[0].mxu0 }
 0x110   : > { %v361_v12 = vadd.f32 %v853_v11, %v787_v10  ;;  %v352_v13 = vpop.f32.mrb[1].mxu0 }
 0x111   : > { %v353_v14 = vadd.f32 %v787_v10, %v352_v13  ;;  %v854_v15 = vpop.f32.mrb[2].mxu0 }
 0x112   : > { %970 = vtanh.f32 %v361_v12  ;;  %v364_v16 = vadd.f32 %v854_v15, %v787_v10  ;;  %v355_v17 = vpop.f32.mrb[3].mxu0 }
 0x113   : > { %972 = vtanh.f32 %v353_v14  ;;  %v356_v18 = vadd.f32 %v787_v10, %v355_v17 }
 0x114   : > { %974 = vtanh.f32 %v364_v16 }
 0x115   : > { %976 = vtanh.f32 %v356_v18 }
 0x117   : > { %v857_v19 = vpop.f32.mrb[4].mxu0 }
 0x118   : > { %v377_v20 = vadd.f32 %v857_v19, %v787_v10  ;;  %v368_v21 = vpop.f32.mrb[5].mxu0 }
 0x119   : > { %v369_v22 = vadd.f32 %v787_v10, %v368_v21  ;;  %v858_v23 = vpop.f32.mrb[6].mxu0 }
 0x11a   : > { %978 = vtanh.f32 %v377_v20  ;;  %v380_v24 = vadd.f32 %v858_v23, %v787_v10  ;;  %v371_v25 = vpop.f32.mrb[7].mxu0 }
 0x11b   : > { %980 = vtanh.f32 %v369_v22  ;;  %v372_v26 = vadd.f32 %v787_v10, %v371_v25 }
 0x11c   : > { %v971_v27 = vpop.eup %970  ;;  %982 = vtanh.f32 %v380_v24 }
 0x11d   : > { %v973_v28 = vpop.eup %972  ;;  %984 = vtanh.f32 %v372_v26 }
 0x11e   : > { %v975_v29 = vpop.eup %974 }
 0x11f   : > { %v977_v30 = vpop.eup %976  ;;  %v392_v31 = vpack.c.bf16 %v975_v29, %v971_v27 }
 0x120   : > { %v391_v32 = vpack.c.bf16 %v977_v30, %v973_v28 }
 0x122   : > { %867 = vmatprep.mubr.msk.bf16.mxu1 %vm432_vm2, %v391_v32  ;;  %v551_v32 = vld [vmem:[%s1330_s4 + $0x2] sm:$0x1] }
 0x123   : > { %868 = vmatmul.mubr.msk.bf16.vlgmr.msra.gmra.mrb[0].mxu1 %vm432_vm2, %v392_v31  ;;  %v969_v31 = vld [vmem:[#allocation2 + $0x18] sm:$0xff]  }
 0x124   : > { %v979_v33 = vpop.eup %978  ;;  %888 = vmatpush3.bf16.msra.mxu1 %v966_v44 }
 0x125   : > { %v981_v34 = vpop.eup %980  ;;  %889 = vmatprep.subr.bf16.mxu1 %v1101_v40 }
 0x126   : > { %v983_v35 = vpop.eup %982 }
 0x127   : > { %v985_v36 = vpop.eup %984  ;;  %v394_v37 = vpack.c.bf16 %v983_v35, %v979_v33 }
 0x128   : > { %v393_v38 = vpack.c.bf16 %v985_v36, %v981_v34  ;;  %890 = vmatpush3.bf16.msra.mxu1 %v967_v45 }
 0x129   : > { %891 = vmatprep.subr.bf16.mxu1 %v1101_v40 }
 0x12a   : > { %871 = vmatprep.mubr.msk.bf16.mxu1 %vm432_vm2, %v393_v38 }
 0x12b   : > { %872 = vmatmul.mubr.msk.bf16.gmra.mrb[4].mxu1 %vm432_vm2, %v394_v37 }
 0x12c   : > { %895 = vmatprep.mubr.msk.bf16.mxu1 %vm1102_vm3, %v1101_v40  ;;  %892 = vmatpush3.bf16.msra.mxu1 %v968_v46 }
 0x12d   : > { %893 = vmatprep.subr.bf16.mxu1 %v1101_v40  ;;  %v629_v40 = vld [vmem:[%s1331_s5] sm:$0x1] }
 0x130   : > { %894 = vmatpush3.bf16.msra.mxu1 %v969_v31 }
 0x1f6   : > { %v869_v48 = vpop.f32.mrb[0].mxu1 }
 0x1f7   : > { %v488_v49 = vadd.f32 %v869_v48, %v796_v47  ;;  %v479_v50 = vpop.f32.mrb[1].mxu1 }
 0x1f8   : > { %v480_v51 = vadd.f32 %v796_v47, %v479_v50  ;;  %v870_v52 = vpop.f32.mrb[2].mxu1 }
 0x1f9   : > { %v482_v53 = vpop.f32.mrb[3].mxu1  ;;  %v491_v54 = vadd.f32 %v870_v52, %v796_v47 }
 0x1fa   : > { %986 = vtanh.f32 %v480_v51  ;;  %v483_v55 = vadd.f32 %v796_v47, %v482_v53 }
 0x1fb   : > { %988 = vtanh.f32 %v488_v49 }
 0x1fc   : > { %990 = vtanh.f32 %v483_v55 }
 0x1fd   : > { %992 = vtanh.f32 %v491_v54 }
 0x1fe   : > { %v873_v56 = vpop.f32.mrb[4].mxu1 }
 0x1ff   : > { %v504_v57 = vadd.f32 %v873_v56, %v796_v47  ;;  %v495_v58 = vpop.f32.mrb[5].mxu1 }
 0x200   : > { %v496_v59 = vadd.f32 %v796_v47, %v495_v58  ;;  %v874_v60 = vpop.f32.mrb[6].mxu1 }
 0x201   : > { %v498_v61 = vpop.f32.mrb[7].mxu1  ;;  %v507_v62 = vadd.f32 %v874_v60, %v796_v47 }
 0x202   : > { %994 = vtanh.f32 %v496_v59  ;;  %v499_v63 = vadd.f32 %v796_v47, %v498_v61 }
 0x203   : > { %996 = vtanh.f32 %v504_v57 }
 0x204   : > { %v987_v0 = vpop.eup %986  ;;  %998 = vtanh.f32 %v499_v63 }
 0x205   : > { %v989_v1 = vpop.eup %988  ;;  %1000 = vtanh.f32 %v507_v62  ;;  %v518_v3 = vsel %vm432_vm2, %v987_v0, 0.0 }
 0x206   : > { %v991_v2 = vpop.eup %990  ;;  %v521_v7 = vsel %vm432_vm2, %v989_v1, 0.0 }
 0x207   : > { %v519_v4 = vsel %vm432_vm2, %v991_v2, 0.0  ;;  %v993_v5 = vpop.eup %992 }
 0x208   : > { %v520_v6 = vadd.f32 %v519_v4, %v518_v3  ;;  %v523_v9 = vsel %vm432_vm2, %v993_v5, 0.0 }
 0x20a   : > { %v522_v8 = vadd.f32 %v521_v7, %v520_v6 }
 0x20c   : > { %v995_v10 = vpop.eup %994  ;;  %v524_v11 = vadd.f32 %v523_v9, %v522_v8 }
 0x20d   : > { %v997_v12 = vpop.eup %996  ;;  %v525_v13 = vsel %vm432_vm2, %v995_v10, 0.0 }
 0x20e   : > { %v999_v14 = vpop.eup %998  ;;  %v526_v15 = vadd.f32 %v525_v13, %v524_v11  ;;  %v529_v19 = vsel %vm432_vm2, %v997_v12, 0.0 }
 0x20f   : > { %v527_v16 = vsel %vm432_vm2, %v999_v14, 0.0  ;;  %v1001_v17 = vpop.eup %1000 }
 0x210   : > { %v528_v18 = vadd.f32 %v527_v16, %v526_v15  ;;  %v531_v21 = vsel %vm432_vm2, %v1001_v17, 0.0 }
 0x212   : > { %v530_v20 = vadd.f32 %v529_v19, %v528_v18 }
 0x214   : > { %v532_v22 = vadd.f32 %v531_v21, %v530_v20 }
 0x216   : > { %v533_v23 = vrot.slane %v532_v22, 4 }
 0x218   : > { %v534_v24 = vadd.f32 %v533_v23, %v532_v22 }
 0x21a   : > { %v535_v25 = vrot.slane %v534_v24, 2 }
 0x21c   : > { %v536_v26 = vadd.f32 %v535_v25, %v534_v24 }
 0x21e   : > { %v537_v27 = vrot.slane %v536_v26, 1 }
 0x220   : > { %v538_v28 = vadd.f32 %v537_v27, %v536_v26 }
 0x222   : > { %v540_v29 = vmul.f32 0.015625, %v538_v28 }
 0x224   : > { %v541_v30 = vpack.c.bf16 %v540_v29, %v540_v29 }
 0x226   : > { %884 = vmatmul.mubr.msk.bf16.vlgmr.msra.gmra.mrb[8].mxu0 %vm432_vm2, %v541_v30 }
 0x2f9   : > { %v613_v33 = vpop.f32.mrb[8].mxu0 }
 0x2fa   : > { %v614_v34 = vadd.f32 %v613_v33, %v551_v32  ;;  %v885_v35 = vpop.f32.mrb[9].mxu0 }
 0x2fb   : > { %v616_v36 = vpop.f32.mrb[10].mxu0 }
 0x2fc   : > { %v619_v37 = vmax.f32 %v614_v34, 0.0  ;;  %v886_v38 = vpop.f32.mrb[11].mxu0 }
 0x2fe   : > { %v620_v39 = vpack.c.bf16 %v619_v37, %v619_v37 }
 0x300   : > { %896 = vmatmul.mubr.msk.bf16.vlgmr.msra.gmra.mrb[8].mxu1 %vm432_vm2, %v620_v39 }
 0x3d3   : > { %v691_v41 = vpop.f32.mrb[8].mxu1 }
 0x3d4   : > { %v692_v42 = vadd.f32 %v691_v41, %v629_v40  ;;  %v897_v43 = vpop.f32.mrb[9].mxu1 }
 0x3d5   : > { %v694_v44 = vpop.f32.mrb[10].mxu1 }
 0x3d6   : > { %v697_v45 = vmax.f32 %v692_v42, 0.0  ;;  %v898_v46 = vpop.f32.mrb[11].mxu1 }
 0x3d8   : > { %698 = vst [vmem:[%s259_s15] sm:$0x1] %v697_v45 }
 0x3d9   : > { %1043 = shalt.err (!%p1040_p7)
}
 0x3da   : > { %s1044_s28 = scalar_lea.hbm %s1284_s17, 16  ;;  %s1048_s13 = scalar_lea.hbm %s1332_s6, 32 }
 0x3db   : > { %p1045_p8 = scmp.ne.s32.totalorder %s1284_s17, %s1044_s28  ;;  %p1049_p1 = scmp.lt.u32.totalorder %s1284_s17, %s1332_s6 }
 0x3dc   : > { %p1050_p0 = scmp.lt.u32.totalorder %s1048_s13, %s1044_s28  ;;  %p1052_p6 = scmp.lt.u32.totalorder %s1044_s28, %s1284_s17 }
 0x3dd   : > { %p1046_p11 = pnand %p1045_p8, %p1343_p9 }
 0x3de   : > { %p1051_p5 = por %p1050_p0, %p1049_p1 }
 0x3df   : > { %p1047_p13 = pneg %p1046_p11 }
 0x3e0   : > { %p1053_p10 = por %p1052_p6, %p1051_p5 }
 0x3e2   : > { %p1054_p12 = pnand %p1053_p10, %p1047_p13 }
 0x3e4   : > { %1057 = shalt.err (!%p1054_p12)
}
 0x3e5   : > { %904 = dma.vmem_to_hbm [thread:$0]  (%p1343_p9), %s1286_s16, 16, %s1284_s17, %s700_s18  }
 0x3e6 PF: > { %p916_p2 = scmp.ge.s32.totalorder %s1096_s24, 2  ;;  %s724_s15 = sand.u32 1, %s1084_s21  }
 0x3e7   : > { %p1344_p3 = scmp.ne.s32.totalorder %s1337_s8, 0  ;;  %s725_s11 = scalar_lea.sflag [#allocation4], %s724_s15 }
 0x3e9   : > { %p911_p4 = pnand %p916_p2, %p1344_p3 }
 0x3eb   : > { %1079 = dma.done.wait (!%p911_p4), %s725_s11, 16  }
 0x3ec   : > { %1081 = vsyncadd (!%p911_p4), %s725_s11, 4294967280  ;;  %p17_p7 = scmp.ge.s32.totalorder %s1164_s27, 4   ;;  %s1345_s21 = smov %s1088_s22 }
 0x3ed   : > { %s1346_s22 = smov %s1092_s23  ;;  %s1347_s23 = smov %s1175_s30 }
 0x3ee   : > { %s1348_s24 = smov %s1164_s27  ;;  %19 = sbr.rel (!%p17_p7) target bundleno = 4 (0x4), region = 85 }
 0x3f5   :  { %729 = vsyncpa [#allocation3], 1 }
 0x3f6   :  { %731 = vsyncpa [#allocation3 + $0x1], 1 }
 0x3f7   :  { %732 = vsyncpa [#allocation4], 1 }
 0x3f8   :  { %734 = vsyncpa [#allocation4 + $0x1], 1 }

</bundles_post_ra>
